<compile_context>
chip_gen: v7x
topology: tpu7x:2x2x1
jax: 0.10.0
libtpu: 0.0.40
codegen_flags: <defaults>
</compile_context>

<pallas_src>
import copy
import math

import jax
import jax.numpy as jnp
from jax.experimental import pallas as pl
from jax.experimental.pallas import tpu as pltpu

# -----------------------------------------------------------------------------
# Registry machinery (mirrors losses/losses.py `make` / `register`)
# -----------------------------------------------------------------------------
losses = {}


def register(name):
    def decorator(cls):
        losses[name] = cls
        return cls
    return decorator


def make(loss_spec, args=None):
    loss_args = copy.deepcopy(loss_spec['args'])
    if type(loss_args) is list:
        if args is not None:
            for i in range(len(loss_args)):
                loss_args[i]['args'].update(args)
        else:
            loss_args = loss_spec['args']
        loss = losses[loss_spec['name']](*loss_args)
    else:
        if args is not None:
            loss_args.update(args)
        else:
            loss_args = loss_spec['args']
        loss = losses[loss_spec['name']](**loss_args)
    return loss


# -----------------------------------------------------------------------------
# Fused Pallas reduction kernel: sum|d| and sum d^2 in one HBM pass
# -----------------------------------------------------------------------------
_LANES = 128
_SUBLANES = 8
_TM_MAX = 2048      # rows per tile: 2048x128 f32 = 1 MiB; 2 in x 2 bufs = 4 MiB VMEM


def _fused_sums_kernel(p_ref, g_ref, l1_ref, mse_ref):
    """Accumulates vreg-shaped partial sums of |p-g| and (p-g)^2.

    Outputs (l1_ref, mse_ref) are (8,128) f32 accumulators resident across the
    inner ("arbitrary") grid axis; all per-step work stays on the VPU.
    """
    i = pl.program_id(1)

    @pl.when(i == 0)
    def _():
        l1_ref[...] = jnp.zeros_like(l1_ref)
        mse_ref[...] = jnp.zeros_like(mse_ref)

    d = p_ref[...].astype(jnp.float32) - g_ref[...].astype(jnp.float32)
    tm = d.shape[0]
    # (tm,128) -> (tm//8, 8, 128): groups whole vregs, so the reshape is
    # layout-free and the axis-0 sum is plain elementwise vector adds.
    l1_ref[...] += jnp.sum(
        jnp.abs(d).reshape(tm // _SUBLANES, _SUBLANES, _LANES), axis=0)
    mse_ref[...] += jnp.sum(
        (d * d).reshape(tm // _SUBLANES, _SUBLANES, _LANES), axis=0)


def _round_up(x, m):
    return -(-x // m) * m


def _flatten_pad(x, rows):
    """Flatten to [rows, 128] in the ORIGINAL dtype, zero-padded."""
    # TODO(synk): a fully zero-copy path would mask the last partial tile
    # in-kernel instead of materializing a padded copy.
    n = math.prod(x.shape)
    flat = jnp.ravel(x)
    pad = rows * _LANES - n
    if pad:
        flat = jnp.pad(flat, (0, pad))
    return flat.reshape(rows, _LANES)


def _fused_abs_sq_means(pred, gt):
    """Single fused pass over pred/gt: (mean|pred-gt|, mean (pred-gt)^2)."""
    assert pred.shape == gt.shape, (pred.shape, gt.shape)
    n = math.prod(pred.shape)
    rows_needed = max(1, -(-n // _LANES))

    if rows_needed <= _TM_MAX:
        tm = _round_up(rows_needed, _SUBLANES)
        p_dim, steps = 1, 1
    else:
        tm = _TM_MAX
        p_dim = 2                      # 2-way megacore split (v7x); serial elsewhere
        steps = -(-rows_needed // (p_dim * tm))
    rows = p_dim * steps * tm

    p2d = _flatten_pad(pred, rows)
    g2d = _flatten_pad(gt, rows)

    in_map = lambda p, i: (p * steps + i, 0)
    out_map = lambda p, i: (p, 0)

    l1_part, mse_part = pl.pallas_call(
        _fused_sums_kernel,
        out_shape=(
            jax.ShapeDtypeStruct((p_dim * _SUBLANES, _LANES), jnp.float32),
            jax.ShapeDtypeStruct((p_dim * _SUBLANES, _LANES), jnp.float32),
        ),
        grid_spec=pltpu.PrefetchScalarGridSpec(
            num_scalar_prefetch=0,
            grid=(p_dim, steps),
            in_specs=[
                pl.BlockSpec((tm, _LANES), in_map),
                pl.BlockSpec((tm, _LANES), in_map),
            ],
            out_specs=[
                pl.BlockSpec((_SUBLANES, _LANES), out_map),
                pl.BlockSpec((_SUBLANES, _LANES), out_map),
            ],
        ),
        compiler_params=pltpu.CompilerParams(
            dimension_semantics=("parallel", "arbitrary")),
    )(p2d, g2d)

    inv_n = jnp.float32(1.0 / n)
    # Padding is zero on both sides -> contributes 0 to both sums.
    return jnp.sum(l1_part) * inv_n, jnp.sum(mse_part) * inv_n


# -----------------------------------------------------------------------------
# Component losses
# -----------------------------------------------------------------------------
@register('l1')
class L1Loss:
    def __init__(self, weight=1.0):
        self.weight = float(weight)

    def from_stats(self, stats):
        loss = self.weight * stats['abs_mean']
        return loss, {'l1': loss}

    def __call__(self, pred, gt):
        abs_mean, sq_mean = _fused_abs_sq_means(pred, gt)
        return self.from_stats({'abs_mean': abs_mean, 'sq_mean': sq_mean})


@register('mse')
class MSELoss:
    def __init__(self, weight=1.0):
        self.weight = float(weight)

    def from_stats(self, stats):
        loss = self.weight * stats['sq_mean']
        return loss, {'mse': loss}

    def __call__(self, pred, gt):
        abs_mean, sq_mean = _fused_abs_sq_means(pred, gt)
        return self.from_stats({'abs_mean': abs_mean, 'sq_mean': sq_mean})


@register('compose')
class Compose:
    """JAX/Pallas port of losses.Compose: sums child losses, merges dicts.

    Children that expose `from_stats` share ONE fused Pallas reduction pass
    over pred/gt (instead of each child re-streaming the tensors from HBM).
    """

    def __init__(self, *args):
        self.fn = [make(arg) for arg in args]
        self._forward_jit = jax.jit(self._forward)

    def _forward(self, pred, gt):
        total_loss = 0
        all_loss_dict = {}
        stats = None
        if any(hasattr(fn, 'from_stats') for fn in self.fn):
            abs_mean, sq_mean = _fused_abs_sq_means(pred, gt)
            stats = {'abs_mean': abs_mean, 'sq_mean': sq_mean}
        for fn in self.fn:
            if hasattr(fn, 'from_stats'):
                loss, loss_dict = fn.from_stats(stats)
            else:
                loss, loss_dict = fn(pred, gt)
            total_loss = total_loss + loss
            all_loss_dict.update(loss_dict)
        return total_loss, all_loss_dict

    def __call__(self, pred, gt):
        return self._forward_jit(pred, gt)


# -----------------------------------------------------------------------------
# Demo
# -----------------------------------------------------------------------------
if __name__ == "__main__":
    key = jax.random.PRNGKey(0)
    k1, k2 = jax.random.split(key)
    # NCHW, small shapes
    pred = jax.random.normal(k1, (2, 4, 16, 16), dtype=jnp.float32)
    gt = jax.random.normal(k2, (2, 4, 16, 16), dtype=jnp.float32)

    compose_spec = {
        'name': 'compose',
        'args': [
            {'name': 'l1', 'args': {'weight': 1.0}},
            {'name': 'mse', 'args': {'weight': 0.5}},
        ],
    }
    loss_fn = make(compose_spec)

    total_loss, loss_dict = loss_fn(pred, gt)
    total_loss = jax.block_until_ready(total_loss)
    for v in loss_dict.values():
        jax.block_until_ready(v)

    # Sanity check against plain-JAX reference
    d = pred - gt
    ref = jnp.mean(jnp.abs(d)) + 0.5 * jnp.mean(d * d)
    assert jnp.allclose(total_loss, ref, rtol=1e-5, atol=1e-5), (total_loss, ref)
    assert jnp.allclose(loss_dict['l1'], jnp.mean(jnp.abs(d)), rtol=1e-5, atol=1e-5)
    assert jnp.allclose(loss_dict['mse'], 0.5 * jnp.mean(d * d), rtol=1e-5, atol=1e-5)

    print("KERNEL_OK")
</pallas_src>

<mosaic_0001>
module attributes {stable_mosaic.version = 11 : i64} {
  func.func @_fused_sums_kernel(%arg0: i32, %arg1: i32, %arg2: memref<16x128xf32, #tpu.memory_space<vmem>>, %arg3: memref<16x128xf32, #tpu.memory_space<vmem>>, %arg4: memref<8x128xf32, #tpu.memory_space<vmem>>, %arg5: memref<8x128xf32, #tpu.memory_space<vmem>>) attributes {dimension_semantics = [#tpu.dimension_semantics<parallel>, #tpu.dimension_semantics<arbitrary>], iteration_bounds = array<i64: 1, 1>, scalar_prefetch = 0 : i64, scratch_operands = 0 : i64, tpu.core_type = #tpu.core_type<tc>, window_params = [{transform_indices = @transform_0, window_bounds = array<i64: 16, 128>}, {transform_indices = @transform_1, window_bounds = array<i64: 16, 128>}, {transform_indices = @transform_2, window_bounds = array<i64: 8, 128>}, {transform_indices = @transform_3, window_bounds = array<i64: 8, 128>}]} {
    %c0_i32 = arith.constant 0 : i32
    %0 = arith.cmpi eq, %arg1, %c0_i32 : i32
    %1 = arith.extui %0 : i1 to i32
    %c0_i32_0 = arith.constant 0 : i32
    %2 = arith.cmpi ne, %1, %c0_i32_0 : i32
    scf.if %2 {
      %cst_13 = arith.constant 0.000000e+00 : f32
      %18 = vector.broadcast %cst_13 : f32 to vector<8x128xf32>
      %c0_14 = arith.constant 0 : index
      %c0_15 = arith.constant 0 : index
      %19 = vector.load %arg4[%c0_14, %c0_15] : memref<8x128xf32, #tpu.memory_space<vmem>>, vector<8x128xf32>
      tpu.vector_store %arg4[%c0_14, %c0_15], %18 {strides = array<i32>} : memref<8x128xf32, #tpu.memory_space<vmem>>, vector<8x128xf32>,
      %cst_16 = arith.constant 0.000000e+00 : f32
      %20 = vector.broadcast %cst_16 : f32 to vector<8x128xf32>
      %c0_17 = arith.constant 0 : index
      %c0_18 = arith.constant 0 : index
      %21 = vector.load %arg5[%c0_17, %c0_18] : memref<8x128xf32, #tpu.memory_space<vmem>>, vector<8x128xf32>
      tpu.vector_store %arg5[%c0_17, %c0_18], %20 {strides = array<i32>} : memref<8x128xf32, #tpu.memory_space<vmem>>, vector<8x128xf32>,
    } else {
    }
    %c0 = arith.constant 0 : index
    %c0_1 = arith.constant 0 : index
    %3 = vector.load %arg2[%c0, %c0_1] : memref<16x128xf32, #tpu.memory_space<vmem>>, vector<16x128xf32>
    %c0_2 = arith.constant 0 : index
    %c0_3 = arith.constant 0 : index
    %4 = vector.load %arg3[%c0_2, %c0_3] : memref<16x128xf32, #tpu.memory_space<vmem>>, vector<16x128xf32>
    %5 = arith.subf %3, %4 : vector<16x128xf32>
    %c0_4 = arith.constant 0 : index
    %c0_5 = arith.constant 0 : index
    %6 = vector.load %arg4[%c0_4, %c0_5] : memref<8x128xf32, #tpu.memory_space<vmem>>, vector<8x128xf32>
    %7 = math.absf %5 : vector<16x128xf32>
    %8 = vector.shape_cast %7 : vector<16x128xf32> to vector<2x8x128xf32>
    %cst = arith.constant dense<0.000000e+00> : vector<8x128xf32>
    %9 = vector.multi_reduction <add>, %8, %cst [0] : vector<2x8x128xf32> to vector<8x128xf32>
    %10 = arith.addf %6, %9 : vector<8x128xf32>
    %c0_6 = arith.constant 0 : index
    %c0_7 = arith.constant 0 : index
    %11 = vector.load %arg4[%c0_6, %c0_7] : memref<8x128xf32, #tpu.memory_space<vmem>>, vector<8x128xf32>
    tpu.vector_store %arg4[%c0_6, %c0_7], %10 {strides = array<i32>} : memref<8x128xf32, #tpu.memory_space<vmem>>, vector<8x128xf32>,
    %c0_8 = arith.constant 0 : index
    %c0_9 = arith.constant 0 : index
    %12 = vector.load %arg5[%c0_8, %c0_9] : memref<8x128xf32, #tpu.memory_space<vmem>>, vector<8x128xf32>
    %13 = arith.mulf %5, %5 : vector<16x128xf32>
    %14 = vector.shape_cast %13 : vector<16x128xf32> to vector<2x8x128xf32>
    %cst_10 = arith.constant dense<0.000000e+00> : vector<8x128xf32>
    %15 = vector.multi_reduction <add>, %14, %cst_10 [0] : vector<2x8x128xf32> to vector<8x128xf32>
    %16 = arith.addf %12, %15 : vector<8x128xf32>
    %c0_11 = arith.constant 0 : index
    %c0_12 = arith.constant 0 : index
    %17 = vector.load %arg5[%c0_11, %c0_12] : memref<8x128xf32, #tpu.memory_space<vmem>>, vector<8x128xf32>
    tpu.vector_store %arg5[%c0_11, %c0_12], %16 {strides = array<i32>} : memref<8x128xf32, #tpu.memory_space<vmem>>, vector<8x128xf32>,
    return
  }
  func.func @transform_0(%arg0: i32, %arg1: i32) -> (i32, i32) {
    %c1_i32 = arith.constant 1 : i32
    %0 = arith.muli %arg0, %c1_i32 : i32
    %1 = arith.addi %0, %arg1 : i32
    %c0_i32 = arith.constant 0 : i32
    %c0_i32_0 = arith.constant 0 : i32
    return %1, %c0_i32 : i32, i32
  }
  func.func @transform_1(%arg0: i32, %arg1: i32) -> (i32, i32) {
    %c1_i32 = arith.constant 1 : i32
    %0 = arith.muli %arg0, %c1_i32 : i32
    %1 = arith.addi %0, %arg1 : i32
    %c0_i32 = arith.constant 0 : i32
    %c0_i32_0 = arith.constant 0 : i32
    return %1, %c0_i32 : i32, i32
  }
  func.func @transform_2(%arg0: i32, %arg1: i32) -> (i32, i32) {
    %c0_i32 = arith.constant 0 : i32
    %c0_i32_0 = arith.constant 0 : i32
    return %arg0, %c0_i32 : i32, i32
  }
  func.func @transform_3(%arg0: i32, %arg1: i32) -> (i32, i32) {
    %c0_i32 = arith.constant 0 : i32
    %c0_i32_0 = arith.constant 0 : i32
    return %arg0, %c0_i32 : i32, i32
  }
}

</mosaic_0001>

<bundles_post_ra>
// kernel: _forward.1
= control target key start
LH: loop header
LB: loop body
LE: loop exit
PB: predicated region body
PF: predicated region fallthrough
CT: control target
= control target key end

     0   :  { %s140_s0 = inlined_call_operand.vmem [shape: f32[16,128], index: 0, kind: input, shape index: {}]   ;;  %s141_s1 = inlined_call_operand.vmem [shape: f32[16,128], index: 1, kind: input, shape index: {}]   ;;  %s142_s2 = inlined_call_operand.vmem [shape: f32[8,128], index: 2, kind: output, shape index: {0}]   ;;  %s143_s3 = inlined_call_operand.vmem [shape: f32[8,128], index: 3, kind: output, shape index: {1}]  }
   0x1   :  { %v63_v0 = vld [vmem:[%s140_s0] sm:$0xff]  ;;  %v64_v1 = vld [vmem:[%s140_s0 + $0x8] sm:$0xff] }
   0x2   :  { %v65_v2 = vld [vmem:[%s141_s1] sm:$0xff]  ;;  %v66_v3 = vld [vmem:[%s141_s1 + $0x8] sm:$0xff] }
   0x3   :  { %v67_v4 = vsub.f32 %v63_v0, %v65_v2  ;;  %v68_v5 = vsub.f32 %v64_v1, %v66_v3 }
   0x5   :  { %v70_v6 = vand.u32 2147483647, %v67_v4  ;;  %v76_v7 = vmul.f32 %v67_v4, %v67_v4  ;;  %v71_v8 = vand.u32 2147483647, %v68_v5  ;;  %v77_v9 = vmul.f32 %v68_v5, %v68_v5 }
   0x7   :  { %v72_v10 = vadd.f32 %v71_v8, %v70_v6  ;;  %v78_v11 = vadd.f32 %v77_v9, %v76_v7 }
   0x9   :  { %74 = vst [vmem:[%s142_s2] sm:$0xff] %v72_v10  ;;  %80 = vst [vmem:[%s143_s3] sm:$0xff] %v78_v11 }

</bundles_post_ra>
